<compile_context>
chip_gen: v7x
topology: tpu7x:2x2x1
jax: 0.10.0
libtpu: 0.0.40
codegen_flags: <defaults>
</compile_context>

<pallas_src>
import functools

import jax
import jax.numpy as jnp
from jax.experimental import pallas as pl
from jax.experimental.pallas import tpu as pltpu


def _vae_kernel(src_ref, eps_ref, enc_ref, dec_ref, out_ref, mulv_ref,
                *, in_dim, z_dim):
    f32 = jnp.float32
    bf16 = jnp.bfloat16

    # ---- Collapsed encoder + fused mu/log_var head: one MXU matmul ----
    x = src_ref[...].astype(bf16)                       # (B, in_dim) bf16
    enc_w = enc_ref[0:in_dim, :]                        # (in_dim, 2*z) bf16
    enc_b = enc_ref[in_dim:in_dim + 1, :].astype(f32)   # (1, 2*z)
    mulv = jnp.dot(x, enc_w, preferred_element_type=f32) + enc_b  # (B, 2*z) f32

    mu = mulv[:, :z_dim]
    log_var = mulv[:, z_dim:]

    # ---- Sampling: z = eps * exp(0.5 * log_var) + mu (f32 elementwise) ----
    std = jnp.exp(0.5 * log_var)
    z = eps_ref[...].astype(f32) * std + mu             # (B, z) f32

    # ---- Collapsed decoder: one MXU matmul + sigmoid ----
    dec_w = dec_ref[0:z_dim, :]                         # (z, in_dim) bf16
    dec_b = dec_ref[z_dim:z_dim + 1, :].astype(f32)     # (1, in_dim)
    logits = jnp.dot(z.astype(bf16), dec_w, preferred_element_type=f32) + dec_b

    out_ref[...] = jax.nn.sigmoid(logits).astype(out_ref.dtype)
    mulv_ref[...] = mulv.astype(mulv_ref.dtype)


def init_vae_params(key, in_dim, hidden_dim1, hidden_dim2, z_dim):
    """Deterministic parameter init (PyTorch-Linear-like uniform init).

    Weights are stored transposed relative to PyTorch: W has shape
    (in_features, out_features); biases have shape (1, out_features).
    """
    def linear(key, fan_in, fan_out):
        kw, kb = jax.random.split(key)
        bound = 1.0 / jnp.sqrt(fan_in)
        w = jax.random.uniform(kw, (fan_in, fan_out), jnp.float32, -bound, bound)
        b = jax.random.uniform(kb, (1, fan_out), jnp.float32, -bound, bound)
        return w, b

    keys = jax.random.split(key, 7)
    params = {}
    params["e1_w"], params["e1_b"] = linear(keys[0], in_dim, hidden_dim1)
    params["e2_w"], params["e2_b"] = linear(keys[1], hidden_dim1, hidden_dim2)
    params["mu_w"], params["mu_b"] = linear(keys[2], hidden_dim2, z_dim)
    params["std_w"], params["std_b"] = linear(keys[3], hidden_dim2, z_dim)
    # Decoder(hidden_dim1, hidden_dim2, z_dim, out_dim=in_dim)
    params["d1_w"], params["d1_b"] = linear(keys[4], z_dim, hidden_dim2)
    params["d2_w"], params["d2_b"] = linear(keys[5], hidden_dim2, hidden_dim1)
    params["out_w"], params["out_b"] = linear(keys[6], hidden_dim1, in_dim)
    return params


def _round_up(x, m):
    return (x + m - 1) // m * m


@jax.jit
def vae_forward(src, eps, params):
    batch, in_dim = src.shape
    z_dim = params["mu_w"].shape[1]

    # ---- Algebraic collapse of the affine chains (tiny; done under jit) ----
    w_head = jnp.concatenate([params["mu_w"], params["std_w"]], axis=1)   # (h2, 2z)
    b_head = jnp.concatenate([params["mu_b"], params["std_b"]], axis=1)   # (1, 2z)
    enc_hw = params["e1_w"] @ params["e2_w"]                              # (in, h2)
    enc_hb = params["e1_b"] @ params["e2_w"] + params["e2_b"]             # (1, h2)
    w_enc = enc_hw @ w_head                                               # (in, 2z)
    b_enc = enc_hb @ w_head + b_head                                      # (1, 2z)

    dec_hw = params["d1_w"] @ params["d2_w"]                              # (z, h1)
    dec_hb = params["d1_b"] @ params["d2_w"] + params["d2_b"]             # (1, h1)
    w_dec = dec_hw @ params["out_w"]                                      # (z, in)
    b_dec = dec_hb @ params["out_w"] + params["out_b"]                    # (1, in)

    # ---- Pack weights + bias row into one bf16 slab per stage (2 DMAs) ----
    # Bias sits on a 16-row (bf16 sublane-tile) aligned boundary.
    enc_slab = jnp.zeros((in_dim + 16, 2 * z_dim), jnp.bfloat16)
    enc_slab = enc_slab.at[:in_dim, :].set(w_enc.astype(jnp.bfloat16))
    enc_slab = enc_slab.at[in_dim:in_dim + 1, :].set(b_enc.astype(jnp.bfloat16))
    dec_slab = jnp.zeros((z_dim + 16, in_dim), jnp.bfloat16)
    dec_slab = dec_slab.at[:z_dim, :].set(w_dec.astype(jnp.bfloat16))
    dec_slab = dec_slab.at[z_dim:z_dim + 1, :].set(b_dec.astype(jnp.bfloat16))

    # ---- Batch tiling: weights stay resident, activations stream ----
    pb = _round_up(batch, 8)
    block_b = min(pb, 512)          # sized well within v7x's 64 MiB VMEM
    pb = _round_up(pb, block_b)
    if pb != batch:
        src_p = jnp.zeros((pb, in_dim), src.dtype).at[:batch].set(src)
        eps_p = jnp.zeros((pb, z_dim), eps.dtype).at[:batch].set(eps)
    else:
        src_p, eps_p = src, eps

    grid = (pb // block_b,)
    kernel = functools.partial(_vae_kernel, in_dim=in_dim, z_dim=z_dim)

    out, mulv = pl.pallas_call(
        kernel,
        grid=grid,
        out_shape=(
            jax.ShapeDtypeStruct((pb, in_dim), jnp.float32),
            jax.ShapeDtypeStruct((pb, 2 * z_dim), jnp.float32),
        ),
        in_specs=[
            pl.BlockSpec((block_b, in_dim), lambda i: (i, 0)),
            pl.BlockSpec((block_b, z_dim), lambda i: (i, 0)),
            pl.BlockSpec((in_dim + 16, 2 * z_dim), lambda i: (0, 0)),
            pl.BlockSpec((z_dim + 16, in_dim), lambda i: (0, 0)),
        ],
        out_specs=(
            pl.BlockSpec((block_b, in_dim), lambda i: (i, 0)),
            pl.BlockSpec((block_b, 2 * z_dim), lambda i: (i, 0)),
        ),
        compiler_params=pltpu.CompilerParams(
            dimension_semantics=("parallel",),
            vmem_limit_bytes=32 * 1024 * 1024,
        ),
    )(src_p, eps_p, enc_slab, dec_slab)

    out = out[:batch]
    mu = mulv[:batch, :z_dim]
    log_var = mulv[:batch, z_dim:]
    return out, mu, log_var


def vae_reference(src, eps, params):
    """Pure-JAX f32 reference following the original (un-collapsed) layer chain."""
    h1 = src @ params["e1_w"] + params["e1_b"]
    h2 = h1 @ params["e2_w"] + params["e2_b"]
    mu = h2 @ params["mu_w"] + params["mu_b"]
    log_var = h2 @ params["std_w"] + params["std_b"]
    z = eps * jnp.exp(0.5 * log_var) + mu
    g1 = z @ params["d1_w"] + params["d1_b"]
    g2 = g1 @ params["d2_w"] + params["d2_b"]
    out = jax.nn.sigmoid(g2 @ params["out_w"] + params["out_b"])
    return out, mu, log_var


if __name__ == "__main__":
    # Small VAE: in_dim=128, hidden_dim1=64, hidden_dim2=32, z_dim=16, batch=8
    in_dim, hidden_dim1, hidden_dim2, z_dim = 128, 64, 32, 16
    batch = 8

    key = jax.random.PRNGKey(0)
    k_params, k_src, k_eps = jax.random.split(key, 3)

    params = init_vae_params(k_params, in_dim, hidden_dim1, hidden_dim2, z_dim)
    src = jax.random.normal(k_src, (batch, in_dim), jnp.float32)
    eps = jax.random.normal(k_eps, (batch, z_dim), jnp.float32)  # torch.randn_like(std)

    out, mu, log_var = vae_forward(src, eps, params)
    jax.block_until_ready((out, mu, log_var))

    # Correctness vs. the f32 un-collapsed reference.  Tolerance reflects the
    # bf16 matmul operands (f32 accumulation) and the collapsed weight products.
    ref_out, ref_mu, ref_lv = vae_reference(src, eps, params)
    assert out.shape == (batch, in_dim)
    assert mu.shape == (batch, z_dim) and log_var.shape == (batch, z_dim)
    assert jnp.allclose(out, ref_out, atol=2e-2, rtol=2e-2)
    assert jnp.allclose(mu, ref_mu, atol=2e-2, rtol=2e-2)
    assert jnp.allclose(log_var, ref_lv, atol=2e-2, rtol=2e-2)

    print("KERNEL_OK")
</pallas_src>

<mosaic_0001>
module attributes {stable_mosaic.version = 11 : i64} {
  func.func @_vae_kernel(%arg0: i32, %arg1: memref<8x128xf32, #tpu.memory_space<vmem>>, %arg2: memref<8x16xf32, #tpu.memory_space<vmem>>, %arg3: memref<144x32xbf16, #tpu.memory_space<vmem>>, %arg4: memref<32x128xbf16, #tpu.memory_space<vmem>>, %arg5: memref<8x128xf32, #tpu.memory_space<vmem>>, %arg6: memref<8x32xf32, #tpu.memory_space<vmem>>) attributes {dimension_semantics = [#tpu.dimension_semantics<parallel>], iteration_bounds = array<i64: 1>, scalar_prefetch = 0 : i64, scratch_operands = 0 : i64, tpu.core_type = #tpu.core_type<tc>, window_params = [{transform_indices = @transform_0, window_bounds = array<i64: 8, 128>}, {transform_indices = @transform_1, window_bounds = array<i64: 8, 16>}, {pipeline_mode = #tpu.pipeline_mode<synchronous>, transform_indices = @transform_2, window_bounds = array<i64: 144, 32>}, {pipeline_mode = #tpu.pipeline_mode<synchronous>, transform_indices = @transform_3, window_bounds = array<i64: 32, 128>}, {transform_indices = @transform_4, window_bounds = array<i64: 8, 128>}, {transform_indices = @transform_5, window_bounds = array<i64: 8, 32>}]} {
    %c0 = arith.constant 0 : index
    %c0_0 = arith.constant 0 : index
    %0 = vector.load %arg1[%c0, %c0_0] : memref<8x128xf32, #tpu.memory_space<vmem>>, vector<8x128xf32>
    %1 = arith.truncf %0 : vector<8x128xf32> to vector<8x128xbf16>
    %c0_1 = arith.constant 0 : index
    %c0_2 = arith.constant 0 : index
    %2 = vector.load %arg3[%c0_1, %c0_2] : memref<144x32xbf16, #tpu.memory_space<vmem>>, vector<128x32xbf16>
    %c128 = arith.constant 128 : index
    %c0_3 = arith.constant 0 : index
    %3 = vector.load %arg3[%c128, %c0_3] : memref<144x32xbf16, #tpu.memory_space<vmem>>, vector<1x32xbf16>
    %4 = arith.extf %3 : vector<1x32xbf16> to vector<1x32xf32>
    %cst = arith.constant dense<0.000000e+00> : vector<8x32xf32>
    %5 = tpu.matmul %1, %2, %cst {dimension_numbers = #tpu.dot_dimension_numbers<[1], [0], [0], [1], [0, 0, 1, 1], [], []>} : vector<8x128xbf16>, vector<128x32xbf16>, vector<8x32xf32> -> vector<8x32xf32>
    %6 = vector.broadcast %4 : vector<1x32xf32> to vector<8x32xf32>
    %7 = arith.addf %5, %6 : vector<8x32xf32>
    %8 = vector.extract_strided_slice %7 {offsets = [0, 0], sizes = [8, 16], strides = [1, 1]} : vector<8x32xf32> to vector<8x16xf32>
    %9 = vector.extract_strided_slice %7 {offsets = [0, 16], sizes = [8, 16], strides = [1, 1]} : vector<8x32xf32> to vector<8x16xf32>
    %cst_4 = arith.constant 5.000000e-01 : f32
    %10 = vector.broadcast %cst_4 : f32 to vector<8x16xf32>
    %11 = arith.mulf %10, %9 : vector<8x16xf32>
    %12 = math.exp %11 : vector<8x16xf32>
    %c0_5 = arith.constant 0 : index
    %c0_6 = arith.constant 0 : index
    %13 = vector.load %arg2[%c0_5, %c0_6] : memref<8x16xf32, #tpu.memory_space<vmem>>, vector<8x16xf32>
    %14 = arith.mulf %13, %12 : vector<8x16xf32>
    %15 = arith.addf %14, %8 : vector<8x16xf32>
    %c0_7 = arith.constant 0 : index
    %c0_8 = arith.constant 0 : index
    %16 = vector.load %arg4[%c0_7, %c0_8] : memref<32x128xbf16, #tpu.memory_space<vmem>>, vector<16x128xbf16>
    %c16 = arith.constant 16 : index
    %c0_9 = arith.constant 0 : index
    %17 = vector.load %arg4[%c16, %c0_9] : memref<32x128xbf16, #tpu.memory_space<vmem>>, vector<1x128xbf16>
    %18 = arith.extf %17 : vector<1x128xbf16> to vector<1x128xf32>
    %19 = arith.truncf %15 : vector<8x16xf32> to vector<8x16xbf16>
    %cst_10 = arith.constant dense<0.000000e+00> : vector<8x128xf32>
    %20 = tpu.matmul %19, %16, %cst_10 {dimension_numbers = #tpu.dot_dimension_numbers<[1], [0], [0], [1], [0, 0, 1, 1], [], []>} : vector<8x16xbf16>, vector<16x128xbf16>, vector<8x128xf32> -> vector<8x128xf32>
    %21 = vector.broadcast %18 : vector<1x128xf32> to vector<8x128xf32>
    %22 = arith.addf %20, %21 : vector<8x128xf32>
    %23 = arith.negf %22 : vector<8x128xf32>
    %24 = math.exp %23 : vector<8x128xf32>
    %cst_11 = arith.constant 1.000000e+00 : f32
    %25 = vector.broadcast %cst_11 : f32 to vector<8x128xf32>
    %26 = arith.addf %25, %24 : vector<8x128xf32>
    %27 = arith.divf %25, %26 : vector<8x128xf32>
    %c0_12 = arith.constant 0 : index
    %c0_13 = arith.constant 0 : index
    %28 = vector.load %arg5[%c0_12, %c0_13] : memref<8x128xf32, #tpu.memory_space<vmem>>, vector<8x128xf32>
    tpu.vector_store %arg5[%c0_12, %c0_13], %27 {strides = array<i32>} : memref<8x128xf32, #tpu.memory_space<vmem>>, vector<8x128xf32>,
    %c0_14 = arith.constant 0 : index
    %c0_15 = arith.constant 0 : index
    %29 = vector.load %arg6[%c0_14, %c0_15] : memref<8x32xf32, #tpu.memory_space<vmem>>, vector<8x32xf32>
    tpu.vector_store %arg6[%c0_14, %c0_15], %7 {strides = array<i32>} : memref<8x32xf32, #tpu.memory_space<vmem>>, vector<8x32xf32>,
    return
  }
  func.func @transform_0(%arg0: i32) -> (i32, i32) {
    %c0_i32 = arith.constant 0 : i32
    %c0_i32_0 = arith.constant 0 : i32
    return %arg0, %c0_i32 : i32, i32
  }
  func.func @transform_1(%arg0: i32) -> (i32, i32) {
    %c0_i32 = arith.constant 0 : i32
    %c0_i32_0 = arith.constant 0 : i32
    return %arg0, %c0_i32 : i32, i32
  }
  func.func @transform_2(%arg0: i32) -> (i32, i32) {
    %c0_i32 = arith.constant 0 : i32
    %c0_i32_0 = arith.constant 0 : i32
    %c0_i32_1 = arith.constant 0 : i32
    return %c0_i32, %c0_i32_0 : i32, i32
  }
  func.func @transform_3(%arg0: i32) -> (i32, i32) {
    %c0_i32 = arith.constant 0 : i32
    %c0_i32_0 = arith.constant 0 : i32
    %c0_i32_1 = arith.constant 0 : i32
    return %c0_i32, %c0_i32_0 : i32, i32
  }
  func.func @transform_4(%arg0: i32) -> (i32, i32) {
    %c0_i32 = arith.constant 0 : i32
    %c0_i32_0 = arith.constant 0 : i32
    return %arg0, %c0_i32 : i32, i32
  }
  func.func @transform_5(%arg0: i32) -> (i32, i32) {
    %c0_i32 = arith.constant 0 : i32
    %c0_i32_0 = arith.constant 0 : i32
    return %arg0, %c0_i32 : i32, i32
  }
}

</mosaic_0001>

<bundles_post_ra>
// kernel: vae_forward.1
= control target key start
LH: loop header
LB: loop body
LE: loop exit
PB: predicated region body
PF: predicated region fallthrough
CT: control target
= control target key end

     0   :  { %v320_v1 = vmov 0.0   ;;  %vm321_vm0 = vmmov 0   ;;  %s408_s0 = inlined_call_operand.vmem [shape: f32[8,128], index: 0, kind: input, shape index: {}]   ;;  %s409_s1 = inlined_call_operand.vmem [shape: f32[8,16], index: 1, kind: input, shape index: {}]   ;;  %s410_s2 = inlined_call_operand.vmem [shape: bf16[144,32], index: 2, kind: input, shape index: {}]   ;;  %s411_s3 = inlined_call_operand.vmem [shape: bf16[32,128], index: 3, kind: input, shape index: {}]   ;;  %s412_s4 = inlined_call_operand.hbm [shape: f32[8,128], index: 4, kind: output, shape index: {0}]   ;;  %s413_s5 = inlined_call_operand.vmem [shape: f32[8,32], index: 5, kind: output, shape index: {1}]  }
   0x1   :  { %v281_v0 = vld [vmem:[%s410_s2] sm:$0xff]   ;;  %251 = vmatprep.subr.bf16.mxu0 %v320_v1  ;;  %271 = vmatprep.subr.bf16.mxu1 %v320_v1  ;;  %v282_v2 = vld [vmem:[%s410_s2 + $0x8] sm:$0xff]   ;;  %v283_v3 = vld [vmem:[%s410_s2 + $0x10] sm:$0xff]  }
   0x2   :  { %252 = vmatpush3.bf16.msra.mxu0 %v281_v0  ;;  %267 = vmatprep.mubr.msk.bf16.mxu0 %vm321_vm0, %v320_v1 }
   0x3   :  { %253 = vmatprep.subr.bf16.mxu0 %v320_v1  ;;  %273 = vmatprep.mubr.msk.bf16.mxu1 %vm321_vm0, %v320_v1 }
   0x6   :  { %254 = vmatpush3.bf16.msra.mxu0 %v282_v2 }
   0x7   :  { %255 = vmatprep.subr.bf16.mxu0 %v320_v1 }
   0x8   :  { %11 = vsyncpa [#allocation3], 0  ;;  %v284_v4 = vld [vmem:[%s410_s2 + $0x18] sm:$0xff]   ;;  %v285_v5 = vld [vmem:[%s410_s2 + $0x20] sm:$0xff]   ;;  %v41_v11 = vlaneseq  ;;  %vm209_vm1 = vcmask 261120   ;;  %vm158_vm2 = vcmask 130048  }
   0x9   :  { %v286_v6 = vld [vmem:[%s410_s2 + $0x28] sm:$0xff]   ;;  %v287_v7 = vld [vmem:[%s410_s2 + $0x30] sm:$0xff]   ;;  %v288_v8 = vld [vmem:[%s410_s2 + $0x38] sm:$0xff]  }
   0xa   :  { %256 = vmatpush3.bf16.msra.mxu0 %v283_v3  ;;  %v21_v9 = vld [vmem:[%s408_s0] sm:$0xff]  ;;  %v42_v12 = vshrl.u32 %v41_v11, 7  ;;  %v145_v31 = vld [vmem:[%s411_s3 + $0x8] sm:$0x1] }
   0xb   :  { %257 = vmatprep.subr.bf16.mxu0 %v320_v1  ;;  %v22_v10 = vpack.c.bf16 %v21_v9, %v21_v9  ;;  %v39_v13 = vld [vmem:[%s410_s2 + $0x40] sm:$0x1]  ;;  %s322_s2 = smov 112   ;;  %v146_v32 = vunpack.c.l.bf16 %v145_v31 }
   0xc   :  { %v40_v14 = vunpack.c.l.bf16 %v39_v13  ;;  %v43_v15 = vsub.s32 0, %v42_v12  ;;  %v289_v24 = vld [vmem:[%s411_s3] sm:$0xff]  }
   0xd   :  { %272 = vmatpush3.bf16.msra.mxu1 %v289_v24  ;;  %v136_v26 = vld [vmem:[%s409_s1] sm:$0xff]  ;;  %s323_s1 = smov [#allocation2]  }
   0xe   :  { %258 = vmatpush3.bf16.msra.mxu0 %v284_v4  ;;  %v44_v16 = vrot.slane %v40_v14, %v43_v15  ;;  %v151_v33 = vrot.slane %v146_v32, %v43_v15  ;;  %s217_s19 = sshll.u32 %s323_s1, 4  ;;  %s218_s19 = int_to_ptr.vmem [resolvable:$true] %s217_s19 }
   0xf   :  { %259 = vmatprep.subr.bf16.mxu0 %v320_v1  ;;  %s296_s20 = scalar_lea.vmem %s218_s19, 128  ;;  %p301_p1 = scmp.lt.s32.totalorder %s218_s19, %s218_s19 }
  0x10   :  { %p297_p0 = scmp.ne.s32.totalorder %s218_s19, %s296_s20  ;;  %p302_p2 = scmp.lt.s32.totalorder %s296_s20, %s296_s20 }
  0x12   :  { %260 = vmatpush3.bf16.msra.mxu0 %v285_v5  ;;  %p303_p3 = por %p302_p2, %p301_p1 }
  0x13   :  { %261 = vmatprep.subr.bf16.mxu0 %v320_v1 }
  0x14   :  { %p304_p4 = pnand %p303_p3, %p297_p0 }
  0x16   :  { %262 = vmatpush3.bf16.msra.mxu0 %v286_v6 }
  0x17   :  { %263 = vmatprep.subr.bf16.mxu0 %v320_v1 }
  0x1a   :  { %264 = vmatpush3.bf16.msra.mxu0 %v287_v7 }
  0x1b   :  { %265 = vmatprep.subr.bf16.mxu0 %v320_v1 }
  0x1e   :  { %266 = vmatpush3.bf16.msra.mxu0 %v288_v8 }
  0x21   :  { %268 = vmatmul.mubr.bf16.vlgmr.msra.gmra.mrb[0].mxu0 %v22_v10 }
  0xf4   :  { %v127_v17 = vpop.f32.mrb[0].mxu0 }
  0xf5   :  { %v128_v18 = vadd.f32 %v127_v17, %v44_v16  ;;  %v269_v19 = vpop.f32.mrb[1].mxu0 }
  0xf6   :  { %v130_v20 = vpop.f32.mrb[2].mxu0 }
  0xf7   :  { %v133_v21 = vmul.f32 0.5, %v128_v18  ;;  %210 = vst.msk [vmem:[%s413_s5] sm:$0xff] %vm209_vm1, %v128_v18  ;;  %v270_v22 = vpop.f32.mrb[3].mxu0 }
  0xf9   :  { %v134_v23 = vmul.f32 1.442695, %v133_v21 }
  0xfb   :  { %290 = vpow2.f32 %v134_v23 }
 0x105   :  { %v291_v25 = vpop.eup %290 }
 0x106   :  { %138 = vrot.lane.b32.xlu0 %v291_v25, %s322_s2 }
 0x178   :  { %v139_v27 = vpop.permute.xlu0 %138 }
 0x179   :  { %v141_v28 = vmul.f32 %v139_v27, %v136_v26 }
 0x17b   :  { %v142_v29 = vadd.f32 %v141_v28, %v128_v18 }
 0x17d   :  { %v147_v30 = vpack.c.bf16 %v142_v29, %v142_v29 }
 0x17f   :  { %274 = vmatmul.mubr.msk.bf16.vlgmr.msra.gmra.mrb[0].mxu1 %vm158_vm2, %v147_v30 }
 0x252   :  { %v196_v34 = vpop.f32.mrb[0].mxu1 }
 0x253   :  { %v197_v35 = vadd.f32 %v196_v34, %v151_v33  ;;  %v275_v36 = vpop.f32.mrb[1].mxu1 }
 0x254   :  { %v199_v37 = vpop.f32.mrb[2].mxu1 }
 0x255   :  { %v239_v38 = vmul.f32 -1.442695, %v197_v35  ;;  %v276_v39 = vpop.f32.mrb[3].mxu1 }
 0x257   :  { %292 = vpow2.f32 %v239_v38 }
 0x261   :  { %v293_v40 = vpop.eup %292 }
 0x262   :  { %v205_v41 = vadd.f32 1.0, %v293_v40 }
 0x264   :  { %294 = vrcp.f32 %v205_v41 }
 0x26e   :  { %v295_v42 = vpop.eup %294 }
 0x26f   :  { %208 = vst [vmem:[#allocation2] sm:$0xff] %v295_v42 }
 0x270   :  { %307 = shalt.err (!%p304_p4)
}
 0x271   :  { %s308_s22 = scalar_lea.hbm %s412_s4, 128 }
 0x272   :  { %p309_p5 = scmp.ne.s32.totalorder %s412_s4, %s308_s22  ;;  %p312_p6 = scmp.lt.u32.totalorder %s308_s22, %s412_s4 }
 0x274   :  { %p314_p7 = pnand %p312_p6, %p309_p5 }
 0x276   :  { %317 = shalt.err (!%p314_p7)
}
 0x277   :  { %220 = dma.vmem_to_hbm [thread:$0]  %s218_s19, 128, %s412_s4, [#allocation3]  }
 0x278   :  { %318 = dma.done.wait [#allocation3], 128  }
 0x279   :  { %319 = vsyncadd [#allocation3], 4294967168 }
 0x27a   :  { %228 = vsyncpa [#allocation3], 1 }

</bundles_post_ra>
